<compile_context>
chip_gen: v6e
topology: v6e:2x2x1
jax: 0.10.0
libtpu: 0.0.40
codegen_flags: <defaults>
</compile_context>

<pallas_src>
import jax
import jax.numpy as jnp
from jax.experimental import pallas as pl
from jax.experimental.pallas import tpu as pltpu


EPS = 1e-7


def _round_up(x, m):
    return m * ((x + m - 1) // m)


def global_cm_kernel(x_ref, wt_ref, b_ref, tt_ref, o_ref, acc_ref):
    k = pl.program_id(1)

    @pl.when(k == 0)
    def _():
        acc_ref[...] = jnp.zeros_like(acc_ref)

    # Partial logits: (NC, tk) bf16 contracted on D with (tb, tk) bf16 -> (NC, tb) f32.
    # Batch lands on the 128-lane axis, so everything downstream is lane-dense.
    acc_ref[...] += jax.lax.dot_general(
        wt_ref[...],
        x_ref[...].astype(jnp.bfloat16),          # in-kernel cast; x streamed as f32
        dimension_numbers=(((1,), (1,)), ((), ())),
        preferred_element_type=jnp.float32,
    )

    @pl.when(k == pl.num_programs(1) - 1)
    def _():
        logits = acc_ref[...] + b_ref[...]             # (NC, TB) + (NC, 1)
        # Numerically stable softmax over classes (axis 0 = sublane reduce over NC=8).
        m = jnp.max(logits, axis=0, keepdims=True)     # (1, TB)
        e = jnp.exp(logits - m)                        # (NC, TB) f32
        s = jnp.sum(e, axis=0, keepdims=True)          # (1, TB)
        # z[j, b] = sum_k T[k, j] * e[k, b]   (T passed pre-transposed -> plain tiny matmul,
        # lane-dense (NC, TB) result; flops negligible)
        z = jnp.dot(tt_ref[...], e, preferred_element_type=jnp.float32)
        # log(p @ T + eps) with p = e / s:  log(z/s + eps) = log(z + eps*s) - log(s)
        o_ref[...] = jnp.log(z + EPS * s) - jnp.log(s)


def global_cm_forward(x_nchw, w, b, transition_mat, *, tb=None):
    """x_nchw: (B, C, H, W); w: (D, NC); b: (NC,); transition_mat: (NC, NC)."""
    B = x_nchw.shape[0]
    D = w.shape[0]
    NC = w.shape[1]

    x_flat = x_nchw.reshape(B, D).astype(jnp.float32)            # no standalone bf16 pass
    w_t = jnp.transpose(w).astype(jnp.bfloat16)                  # (NC, D): lane-dense on D
    b2 = b.reshape(NC, 1).astype(jnp.float32)                    # bias column for (NC, TB)
    t_t = jnp.transpose(transition_mat).astype(jnp.float32)      # (NC, NC): z = T^T @ e

    # ---- batch tile: DMA amortization first; keep >=2 grid steps for v7x when possible.
    if tb is None:
        if B <= 128:
            tb = _round_up(max(B, 1), 8)                         # single step, full-dim block
        else:
            tb = min(512, _round_up(-(-B // 2), 128))            # 128-aligned lane-dense tiles
    b_pad = _round_up(B, tb)

    # ---- feature (D) tile: keep the double-buffered f32 x tile within ~16 MiB of VMEM.
    x_buf_budget = 8 << 20                                       # bytes per x buffer
    tk_budget = max(128, x_buf_budget // (4 * tb))
    if D <= tk_budget:
        tk, d_pad = D, D
    else:
        tk = (tk_budget // 128) * 128
        d_pad = _round_up(D, tk)

    if b_pad != B or d_pad != D:
        x_flat = jnp.pad(x_flat, ((0, b_pad - B), (0, d_pad - D)))
    if d_pad != D:
        w_t = jnp.pad(w_t, ((0, 0), (0, d_pad - D)))

    out_t = pl.pallas_call(
        global_cm_kernel,
        out_shape=jax.ShapeDtypeStruct((NC, b_pad), jnp.float32),
        grid=(b_pad // tb, d_pad // tk),
        in_specs=[
            pl.BlockSpec((tb, tk), lambda i, k: (i, k)),         # streamed x tiles (f32)
            pl.BlockSpec((NC, tk), lambda i, k: (0, k)),         # weight chunks (bf16)
            pl.BlockSpec((NC, 1), lambda i, k: (0, 0)),          # resident bias column
            pl.BlockSpec((NC, NC), lambda i, k: (0, 0)),         # resident transition (T^T)
        ],
        out_specs=pl.BlockSpec((NC, tb), lambda i, k: (0, i)),   # lane-dense output
        scratch_shapes=[pltpu.VMEM((NC, tb), jnp.float32)],      # logits accumulator over D
        compiler_params=pltpu.CompilerParams(
            dimension_semantics=("parallel", "arbitrary"),       # v7x megacore on batch axis
            vmem_limit_bytes=32 << 20,                           # explicit (v5e default is 16 MiB)
        ),
    )(x_flat, w_t, b2, t_t)

    return jnp.transpose(out_t)[:B]


def reference_forward_bf16(x_nchw, w, b, transition_mat):
    """Reference with the same bf16-input / f32-accumulate precision path."""
    B = x_nchw.shape[0]
    x_flat = x_nchw.reshape(B, -1).astype(jnp.bfloat16)
    logits = jnp.dot(x_flat, w.astype(jnp.bfloat16),
                     preferred_element_type=jnp.float32) + b.astype(jnp.float32)
    p = jax.nn.softmax(logits, axis=1)
    return jnp.log(p @ transition_mat.astype(jnp.float32) + EPS)


def reference_forward_f32(x_nchw, w, b, transition_mat):
    """Pure-f32 reference matching the original torch semantics (loose check)."""
    B = x_nchw.shape[0]
    x_flat = x_nchw.reshape(B, -1).astype(jnp.float32)
    logits = x_flat @ w + b
    p = jax.nn.softmax(logits, axis=1)
    return jnp.log(p @ transition_mat + EPS)


if __name__ == "__main__":
    # Small shapes consistent with the module's forward.
    B, C, H, W = 2, 4, 16, 16
    NC = 8                      # number of classes (softmax dim=1 size)
    D = C * H * W               # flattened feature dim for the linear base model

    key = jax.random.PRNGKey(0)
    kx, kw, kb = jax.random.split(key, 3)

    x = jax.random.normal(kx, (B, C, H, W), dtype=jnp.float32)

    # Deterministic base_model (Linear) parameters.
    w_lin = jax.random.normal(kw, (D, NC), dtype=jnp.float32) * 0.02
    b_lin = jax.random.normal(kb, (NC,), dtype=jnp.float32) * 0.01

    # Deterministic fixed transition (channel-weights / confusion) matrix:
    # row-stochastic, diagonally dominant.
    transition_mat = (0.9 * jnp.eye(NC, dtype=jnp.float32)
                      + 0.1 / NC * jnp.ones((NC, NC), dtype=jnp.float32))

    out = global_cm_forward(x, w_lin, b_lin, transition_mat)
    out = jax.block_until_ready(out)
    assert out.shape == (B, NC)

    # Tight check vs a reference using the same bf16 first-matmul precision path.
    ref_bf16 = reference_forward_bf16(x, w_lin, b_lin, transition_mat)
    assert jnp.allclose(out, ref_bf16, atol=2e-3, rtol=2e-3), "mismatch vs bf16-path reference"

    # Loose check vs the pure-f32 PyTorch-semantics reference (bf16 MXU inputs).
    ref_f32 = reference_forward_f32(x, w_lin, b_lin, transition_mat)
    assert jnp.allclose(out, ref_f32, atol=5e-2, rtol=5e-2), "mismatch vs f32 reference"

    print("KERNEL_OK")
</pallas_src>

<mosaic_0001>
module attributes {stable_mosaic.version = 11 : i64} {
  func.func @global_cm_kernel(%arg0: i32, %arg1: i32, %arg2: memref<8x1024xf32, #tpu.memory_space<vmem>>, %arg3: memref<8x1024xbf16, #tpu.memory_space<vmem>>, %arg4: memref<8x1xf32, #tpu.memory_space<vmem>>, %arg5: memref<8x8xf32, #tpu.memory_space<vmem>>, %arg6: memref<8x8xf32, #tpu.memory_space<vmem>>, %arg7: memref<8x8xf32, #tpu.memory_space<vmem>>) attributes {dimension_semantics = [#tpu.dimension_semantics<parallel>, #tpu.dimension_semantics<arbitrary>], iteration_bounds = array<i64: 1, 1>, scalar_prefetch = 0 : i64, scratch_operands = 1 : i64, tpu.core_type = #tpu.core_type<tc>, window_params = [{transform_indices = @transform_0, window_bounds = array<i64: 8, 1024>}, {transform_indices = @transform_1, window_bounds = array<i64: 8, 1024>}, {pipeline_mode = #tpu.pipeline_mode<synchronous>, transform_indices = @transform_2, window_bounds = array<i64: 8, 1>}, {pipeline_mode = #tpu.pipeline_mode<synchronous>, transform_indices = @transform_3, window_bounds = array<i64: 8, 8>}, {transform_indices = @transform_4, window_bounds = array<i64: 8, 8>}]} {
    %c0_i32 = arith.constant 0 : i32
    %0 = arith.cmpi eq, %arg1, %c0_i32 : i32
    %1 = arith.extui %0 : i1 to i32
    %c0_i32_0 = arith.constant 0 : i32
    %2 = arith.cmpi ne, %1, %c0_i32_0 : i32
    scf.if %2 {
      %cst_10 = arith.constant 0.000000e+00 : f32
      %13 = vector.broadcast %cst_10 : f32 to vector<8x8xf32>
      %c0_11 = arith.constant 0 : index
      %c0_12 = arith.constant 0 : index
      %14 = vector.load %arg7[%c0_11, %c0_12] : memref<8x8xf32, #tpu.memory_space<vmem>>, vector<8x8xf32>
      tpu.vector_store %arg7[%c0_11, %c0_12], %13 {strides = array<i32>} : memref<8x8xf32, #tpu.memory_space<vmem>>, vector<8x8xf32>,
    } else {
    }
    %c0 = arith.constant 0 : index
    %c0_1 = arith.constant 0 : index
    %3 = vector.load %arg7[%c0, %c0_1] : memref<8x8xf32, #tpu.memory_space<vmem>>, vector<8x8xf32>
    %c0_2 = arith.constant 0 : index
    %c0_3 = arith.constant 0 : index
    %4 = vector.load %arg3[%c0_2, %c0_3] : memref<8x1024xbf16, #tpu.memory_space<vmem>>, vector<8x1024xbf16>
    %c0_4 = arith.constant 0 : index
    %c0_5 = arith.constant 0 : index
    %5 = vector.load %arg2[%c0_4, %c0_5] : memref<8x1024xf32, #tpu.memory_space<vmem>>, vector<8x1024xf32>
    %6 = arith.truncf %5 : vector<8x1024xf32> to vector<8x1024xbf16>
    %cst = arith.constant dense<0.000000e+00> : vector<8x8xf32>
    %7 = tpu.matmul %4, %6, %cst {dimension_numbers = #tpu.dot_dimension_numbers<[1], [1], [0], [0], [0, 0, 1, 0], [], []>} : vector<8x1024xbf16>, vector<8x1024xbf16>, vector<8x8xf32> -> vector<8x8xf32>
    %8 = arith.addf %3, %7 : vector<8x8xf32>
    %c0_6 = arith.constant 0 : index
    %c0_7 = arith.constant 0 : index
    %9 = vector.load %arg7[%c0_6, %c0_7] : memref<8x8xf32, #tpu.memory_space<vmem>>, vector<8x8xf32>
    tpu.vector_store %arg7[%c0_6, %c0_7], %8 {strides = array<i32>} : memref<8x8xf32, #tpu.memory_space<vmem>>, vector<8x8xf32>,
    %c0_i32_8 = arith.constant 0 : i32
    %10 = arith.cmpi eq, %arg1, %c0_i32_8 : i32
    %11 = arith.extui %10 : i1 to i32
    %c0_i32_9 = arith.constant 0 : i32
    %12 = arith.cmpi ne, %11, %c0_i32_9 : i32
    scf.if %12 {
      %c0_10 = arith.constant 0 : index
      %c0_11 = arith.constant 0 : index
      %13 = vector.load %arg7[%c0_10, %c0_11] : memref<8x8xf32, #tpu.memory_space<vmem>>, vector<8x8xf32>
      %c0_12 = arith.constant 0 : index
      %c0_13 = arith.constant 0 : index
      %14 = vector.load %arg4[%c0_12, %c0_13] : memref<8x1xf32, #tpu.memory_space<vmem>>, vector<8x1xf32>
      %15 = vector.broadcast %14 : vector<8x1xf32> to vector<8x8xf32>
      %16 = arith.addf %13, %15 : vector<8x8xf32>
      %cst_14 = arith.constant dense<0xFF800000> : vector<8xf32>
      %17 = vector.multi_reduction <maximumf>, %16, %cst_14 [0] : vector<8x8xf32> to vector<8xf32>
      %18 = vector.shape_cast %17 : vector<8xf32> to vector<1x8xf32>
      %19 = vector.broadcast %18 : vector<1x8xf32> to vector<8x8xf32>
      %20 = arith.subf %16, %19 : vector<8x8xf32>
      %21 = math.exp %20 : vector<8x8xf32>
      %cst_15 = arith.constant dense<0.000000e+00> : vector<8xf32>
      %22 = vector.multi_reduction <add>, %21, %cst_15 [0] : vector<8x8xf32> to vector<8xf32>
      %23 = vector.shape_cast %22 : vector<8xf32> to vector<1x8xf32>
      %c0_16 = arith.constant 0 : index
      %c0_17 = arith.constant 0 : index
      %24 = vector.load %arg5[%c0_16, %c0_17] : memref<8x8xf32, #tpu.memory_space<vmem>>, vector<8x8xf32>
      %cst_18 = arith.constant dense<0.000000e+00> : vector<8x8xf32>
      %25 = tpu.matmul %24, %21, %cst_18 {dimension_numbers = #tpu.dot_dimension_numbers<[1], [0], [0], [1], [0, 0, 1, 1], [], []>} : vector<8x8xf32>, vector<8x8xf32>, vector<8x8xf32> -> vector<8x8xf32>
      %cst_19 = arith.constant 1.000000e-07 : f32
      %26 = vector.broadcast %cst_19 : f32 to vector<1x8xf32>
      %27 = arith.mulf %26, %23 : vector<1x8xf32>
      %28 = vector.broadcast %27 : vector<1x8xf32> to vector<8x8xf32>
      %29 = arith.addf %25, %28 : vector<8x8xf32>
      %30 = math.log %29 : vector<8x8xf32>
      %31 = math.log %23 : vector<1x8xf32>
      %32 = vector.broadcast %31 : vector<1x8xf32> to vector<8x8xf32>
      %33 = arith.subf %30, %32 : vector<8x8xf32>
      %c0_20 = arith.constant 0 : index
      %c0_21 = arith.constant 0 : index
      %34 = vector.load %arg6[%c0_20, %c0_21] : memref<8x8xf32, #tpu.memory_space<vmem>>, vector<8x8xf32>
      tpu.vector_store %arg6[%c0_20, %c0_21], %33 {strides = array<i32>} : memref<8x8xf32, #tpu.memory_space<vmem>>, vector<8x8xf32>,
    } else {
    }
    return
  }
  func.func @transform_0(%arg0: i32, %arg1: i32) -> (i32, i32) {
    %c0_i32 = arith.constant 0 : i32
    return %arg0, %arg1 : i32, i32
  }
  func.func @transform_1(%arg0: i32, %arg1: i32) -> (i32, i32) {
    %c0_i32 = arith.constant 0 : i32
    %c0_i32_0 = arith.constant 0 : i32
    return %c0_i32, %arg1 : i32, i32
  }
  func.func @transform_2(%arg0: i32, %arg1: i32) -> (i32, i32) {
    %c0_i32 = arith.constant 0 : i32
    %c0_i32_0 = arith.constant 0 : i32
    %c0_i32_1 = arith.constant 0 : i32
    return %c0_i32, %c0_i32_0 : i32, i32
  }
  func.func @transform_3(%arg0: i32, %arg1: i32) -> (i32, i32) {
    %c0_i32 = arith.constant 0 : i32
    %c0_i32_0 = arith.constant 0 : i32
    %c0_i32_1 = arith.constant 0 : i32
    return %c0_i32, %c0_i32_0 : i32, i32
  }
  func.func @transform_4(%arg0: i32, %arg1: i32) -> (i32, i32) {
    %c0_i32 = arith.constant 0 : i32
    %c0_i32_0 = arith.constant 0 : i32
    return %c0_i32, %arg0 : i32, i32
  }
}

</mosaic_0001>

<bundles_post_ra>
// kernel: tpu_custom_call.1
= control target key start
LH: loop header
LB: loop body
LE: loop exit
PB: predicated region body
PF: predicated region fallthrough
CT: control target
= control target key end

     0   :  { %9 = vsyncpa [#allocation4], 0  ;;  %s541_s0 = inlined_call_operand.hbm [shape: f32[8,1024], index: 0, kind: input, shape index: {}]   ;;  %s542_s1 = inlined_call_operand.hbm [shape: bf16[8,1024], index: 1, kind: input, shape index: {}]   ;;  %s543_s2 = inlined_call_operand.vmem [shape: f32[8,1], index: 2, kind: input, shape index: {}]   ;;  %s544_s3 = inlined_call_operand.vmem [shape: f32[8,8], index: 3, kind: input, shape index: {}]   ;;  %s545_s4 = inlined_call_operand.hbm [shape: f32[8,8], index: 4, kind: output, shape index: {}]  }
   0x1   :  { %10 = vsyncpa [#allocation7], 0 }
   0x2   :  { %11 = vsyncpa [#allocation5], 0  ;;  %s489_s15 = smov [#allocation3]   ;;  %s490_s17 = smov [#allocation6]  }
   0x3   :  { %s18_s16 = sshll.u32 %s489_s15, 4  ;;  %s28_s18 = sshll.u32 %s490_s17, 4  ;;  %s19_s16 = int_to_ptr.vmem [resolvable:$true] %s18_s16  ;;  %s29_s18 = int_to_ptr.vmem [resolvable:$true] %s28_s18 }
   0x4   :  { %s431_s19 = scalar_lea.vmem %s19_s16, 1024  ;;  %p436_p1 = scmp.lt.s32.totalorder %s19_s16, %s19_s16 }
   0x5   :  { %p432_p0 = scmp.ne.s32.totalorder %s19_s16, %s431_s19  ;;  %p437_p2 = scmp.lt.s32.totalorder %s431_s19, %s431_s19 }
   0x7   :  { %p438_p3 = por %p437_p2, %p436_p1 }
   0x9   :  { %p439_p4 = pnand %p438_p3, %p432_p0 }
   0xb   :  { %442 = shalt.err (!%p439_p4)
}
   0xc   :  { %21 = dma.hbm_to_vmem [thread:$0]  %s541_s0, 1024, %s19_s16, [#allocation4]  }
   0xd   :  { %s451_s22 = scalar_lea.vmem %s29_s18, 512  ;;  %p456_p6 = scmp.lt.s32.totalorder %s29_s18, %s29_s18 }
   0xe   :  { %p452_p5 = scmp.ne.s32.totalorder %s29_s18, %s451_s22  ;;  %p457_p7 = scmp.lt.s32.totalorder %s451_s22, %s451_s22 }
  0x10   :  { %p458_p8 = por %p457_p7, %p456_p6 }
  0x12   :  { %p459_p9 = pnand %p458_p8, %p452_p5 }
  0x14   :  { %462 = shalt.err (!%p459_p9)
}
  0x15   :  { %31 = dma.hbm_to_vmem [thread:$0]  %s542_s1, 512, %s29_s18, [#allocation7]  }
  0x16   :  { %483 = dma.done.wait [#allocation4], 1024  }
  0x17   :  { %484 = vsyncadd [#allocation4], 4294966272 }
  0x18   :  { %485 = dma.done.wait [#allocation7], 512  }
  0x19   :  { %486 = vsyncadd [#allocation7], 4294966784  ;;  %v491_v0 = vmov 0   ;;  %v55_v1 = vld [vmem:[#allocation3 + $0x8] sm:$0xff]  ;;  %v57_v2 = vld [vmem:[#allocation3 + $0x18] sm:$0xff]  ;;  %vm47_vm0 = vcmask 64512  }
  0x1a   :  { %408 = vset.pattern.permute.xlu0 %v491_v0  ;;  %v54_v3 = vld [vmem:[#allocation3] sm:$0xff]  ;;  %v63_v4 = vpack.c.bf16 %v55_v1, %v55_v1  ;;  %v65_v5 = vpack.c.bf16 %v57_v2, %v57_v2  ;;  %v56_v7 = vld [vmem:[#allocation3 + $0x10] sm:$0xff]  ;;  %v51_v9 = vld [vmem:[#allocation6 + $0x8] sm:$0xff]  ;;  %v492_v30 = vmov 0.0   ;;  %vm493_vm1 = vmmov 0  }
  0x1b   :  { %v62_v6 = vpack.c.bf16 %v54_v3, %v54_v3  ;;  %v50_v8 = vld [vmem:[#allocation6] sm:$0xff]  ;;  %v64_v10 = vpack.c.bf16 %v56_v7, %v56_v7  ;;  %v59_v12 = vld [vmem:[#allocation3 + $0x28] sm:$0xff]  ;;  %v61_v13 = vld [vmem:[#allocation3 + $0x38] sm:$0xff]  ;;  %v389_v14 = vcombine.high %v51_v9, %v51_v9  ;;  %v388_v23 = vcombine.low %v51_v9, %v51_v9  ;;  %48 = vst.msk [vmem:[#allocation2] sm:$0xff] %vm47_vm0, %v492_v30 }
  0x1c   :  { %v387_v11 = vcombine.high %v50_v8, %v50_v8  ;;  %112 = vmatprep.subr.bf16.mxu0 %v63_v4  ;;  %152 = vmatprep.subr.bf16.mxu1 %v65_v5  ;;  %v67_v15 = vpack.c.bf16 %v59_v12, %v59_v12  ;;  %v69_v16 = vpack.c.bf16 %v61_v13, %v61_v13  ;;  %v265_v17 = vld [vmem:[%s543_s2] sm:$0xff]  ;;  %v58_v18 = vld [vmem:[#allocation3 + $0x20] sm:$0xff]  ;;  %v60_v19 = vld [vmem:[#allocation3 + $0x30] sm:$0xff] }
  0x1d   :  { %113 = vmatpush1.bf16.xpose.msra.mxu0 %v62_v6  ;;  %153 = vmatpush1.bf16.xpose.msra.mxu1 %v64_v10  ;;  %v52_v20 = vld [vmem:[#allocation6 + $0x10] sm:$0xff]  ;;  %v53_v21 = vld [vmem:[#allocation6 + $0x18] sm:$0xff]  ;;  %v386_v22 = vcombine.low %v50_v8, %v50_v8  ;;  %v66_v24 = vpack.c.bf16 %v58_v18, %v58_v18  ;;  %v68_v25 = vpack.c.bf16 %v60_v19, %v60_v19 }
  0x1e   :  { %130 = vmatprep.mubr.bf16.mxu0 %v387_v11  ;;  %170 = vmatprep.mubr.bf16.mxu1 %v389_v14  ;;  %v391_v26 = vcombine.high %v52_v20, %v52_v20  ;;  %v393_v27 = vcombine.high %v53_v21, %v53_v21  ;;  %v390_v28 = vcombine.low %v52_v20, %v52_v20  ;;  %v289_v0 = vld [vmem:[%s544_s3] sm:$0xff]  ;;  %s494_s3 = smov [#allocation8]  }
  0x1f   :  { %192 = vmatprep.subr.bf16.mxu0 %v67_v15  ;;  %232 = vmatprep.subr.bf16.mxu1 %v69_v16  ;;  %v392_v29 = vcombine.low %v53_v21, %v53_v21  ;;  %s376_s26 = sshll.u32 %s494_s3, 4  ;;  %s377_s26 = int_to_ptr.vmem [resolvable:$true] %s376_s26 }
  0x20   :  { %268 = vperm.xlu0 %408, %v265_v17   ;;  %s463_s27 = scalar_lea.vmem %s377_s26, 128  ;;  %p468_p11 = scmp.lt.s32.totalorder %s377_s26, %s377_s26 }
  0x21   :  { %p464_p10 = scmp.ne.s32.totalorder %s377_s26, %s463_s27  ;;  %p469_p12 = scmp.lt.s32.totalorder %s463_s27, %s463_s27 }
  0x22   :  { %v49_v45 = vld [vmem:[#allocation2] sm:$0xff] }
  0x23   :  { %p470_p13 = por %p469_p12, %p468_p11 }
  0x24   :  { %131 = vmatmul.mubr.bf16.vlgmr.msra.gmra.mxu0 %v386_v22  ;;  %171 = vmatmul.mubr.bf16.vlgmr.msra.gmra.mxu1 %v388_v23 }
  0x25   :  { %193 = vmatpush1.bf16.xpose.msra.mxu0 %v66_v24  ;;  %233 = vmatpush1.bf16.xpose.msra.mxu1 %v68_v25  ;;  %p471_p0 = pnand %p470_p13, %p464_p10 }
  0x26   :  { %210 = vmatprep.mubr.bf16.mxu0 %v391_v26  ;;  %250 = vmatprep.mubr.bf16.mxu1 %v393_v27 }
  0x27   :  { %397 = vmatprep.subr.mxu0 %v492_v30 }
  0x2c   :  { %211 = vmatmul.mubr.bf16.vlgmr.msra.gmra.mxu0 %v390_v28  ;;  %251 = vmatmul.mubr.bf16.vlgmr.msra.gmra.mxu1 %v392_v29 }
  0x2d   :  { %399 = vmatprep.mubr.msk.f32.mxu0 %vm493_vm1, %v492_v30 }
  0x9b   :  { %v269_v52 = vpop.permute.xlu0 %268 }
  0xe4   :  { %v132_v31 = vpop.f32.mrf.mxu0  ;;  %v172_v32 = vpop.f32.mrf.mxu1 }
  0xe5   :  { %v173_v39 = vadd.f32 %v172_v32, %v132_v31 }
  0xe6   :  { %v134_v33 = vpop.f32.mrf.mxu0  ;;  %v174_v34 = vpop.f32.mrf.mxu1 }
  0xe8   :  { %v135_v35 = vpop.f32.mrf.mxu0  ;;  %v175_v36 = vpop.f32.mrf.mxu1 }
  0xea   :  { %v136_v37 = vpop.f32.mrf.mxu0  ;;  %v176_v38 = vpop.f32.mrf.mxu1 }
  0xec   :  { %v212_v40 = vpop.f32.mrf.mxu0  ;;  %v252_v41 = vpop.f32.mrf.mxu1 }
  0xed   :  { %v213_v42 = vadd.f32 %v212_v40, %v173_v39 }
  0xee   :  { %v214_v43 = vpop.f32.mrf.mxu0  ;;  %v254_v44 = vpop.f32.mrf.mxu1 }
  0xef   :  { %v253_v46 = vadd.f32 %v252_v41, %v213_v42 }
  0xf0   :  { %v215_v47 = vpop.f32.mrf.mxu0  ;;  %v255_v48 = vpop.f32.mrf.mxu1 }
  0xf1   :  { %v258_v49 = vadd.f32 %v253_v46, %v49_v45 }
  0xf2   :  { %v216_v50 = vpop.f32.mrf.mxu0  ;;  %v256_v51 = vpop.f32.mrf.mxu1 }
  0xf3   :  { %260 = vst.msk [vmem:[#allocation2] sm:$0xff] %vm47_vm0, %v258_v49 }
  0xfa   :  { %v264_v53 = vld [vmem:[#allocation2] sm:$0xff] }
  0xfb   :  { %v271_v54 = vadd.f32 %v269_v52, %v264_v53 }
  0xfd   :  { %v272_v55 = vsel %vm47_vm0, %v271_v54, -inf }
  0xfe   :  { %v273_v56 = vrot.slane %v272_v55, 4 }
 0x100   :  { %v274_v57 = vmax.f32 %v272_v55, %v273_v56 }
 0x102   :  { %v275_v58 = vrot.slane %v274_v57, 2 }
 0x104   :  { %v276_v59 = vmax.f32 %v274_v57, %v275_v58 }
 0x106   :  { %v277_v60 = vrot.slane %v276_v59, 1 }
 0x108   :  { %v278_v61 = vmax.f32 %v276_v59, %v277_v60 }
 0x10a   :  { %v279_v62 = vsub.f32 %v271_v54, %v278_v61 }
 0x10c   :  { %v280_v63 = vmul.f32 1.442695, %v279_v62 }
 0x10e   :  { %417 = vpow2.f32 %v280_v63 }
 0x11b   :  { %v418_v1 = vpop.eup %417 }
 0x11c   :  { %398 = vmatpush3.msra.mxu0 %v418_v1  ;;  %v282_v2 = vsel %vm47_vm0, %v418_v1, 0.0 }
 0x11d   :  { %400 = vmatmul.mubr.msk.f32.vlgmr.msra.gmra.mxu0 %vm47_vm0, %v289_v0  ;;  %v283_v3 = vrot.slane %v282_v2, 4 }
 0x11f   :  { %v284_v4 = vadd.f32 %v283_v3, %v282_v2 }
 0x121   :  { %v285_v5 = vrot.slane %v284_v4, 2 }
 0x123   :  { %v286_v6 = vadd.f32 %v285_v5, %v284_v4 }
 0x125   :  { %v287_v7 = vrot.slane %v286_v6, 1 }
 0x127   :  { %v288_v8 = vadd.f32 %v287_v7, %v286_v6 }
 0x129   :  { %v290_v9 = vmul.f32 1e-07, %v288_v8  ;;  %419 = vlog2.f32 %v288_v8 }
 0x136   :  { %v420_v13 = vpop.eup %419 }
 0x137   :  { %v367_v16 = vmul.f32 0.6931472, %v420_v13 }
 0x1dd   :  { %v360_v10 = vpop.f32.mrf.mxu0 }
 0x1de   :  { %v361_v11 = vadd.f32 %v360_v10, %v290_v9 }
 0x1df   :  { %v401_v12 = vpop.f32.mrf.mxu0 }
 0x1e0   :  { %421 = vlog2.f32 %v361_v11 }
 0x1ed   :  { %v422_v14 = vpop.eup %421 }
 0x1ee   :  { %v365_v15 = vmul.f32 0.6931472, %v422_v14 }
 0x1f0   :  { %v368_v17 = vsub.f32 %v365_v15, %v367_v16 }
 0x1f2   :  { %369 = vst.msk [vmem:[#allocation8] sm:$0xff] %vm47_vm0, %v368_v17 }
 0x1f3   :  { %474 = shalt.err (!%p471_p0)
}
 0x1f4   :  { %379 = dma.vmem_to_hbm [thread:$0]  %s377_s26, 128, %s545_s4, [#allocation5]  }
 0x1f5   :  { %487 = dma.done.wait [#allocation5], 128  }
 0x1f6   :  { %488 = vsyncadd [#allocation5], 4294967168 }
 0x1f7   :  { %383 = vsyncpa [#allocation4], 1 }
 0x1f8   :  { %384 = vsyncpa [#allocation7], 1 }
 0x1f9   :  { %385 = vsyncpa [#allocation5], 1 }

</bundles_post_ra>
